<compile_context>
chip_gen: v7x
topology: tpu7x:2x2x1
jax: 0.10.0
libtpu: 0.0.40
codegen_flags: <defaults>
</compile_context>

<pallas_src>
import jax
import jax.numpy as jnp
from jax.experimental import pallas as pl
from jax.experimental.pallas import tpu as pltpu

LANE = 128  # lane-dense padding target for the action dimension (in-VMEM only)


def _softmax_policy_kernel(x_ref, w_ref, b_ref, o_ref):
    n_act = o_ref.shape[-1]

    # logits = x @ W_pad + b_pad over the LANE-padded action axis.
    # w_ref is (in_dim, LANE): canonical (M,K)x(K,N) MXU matmul, f32 accumulate.
    logits = jnp.dot(x_ref[...], w_ref[...], preferred_element_type=jnp.float32)
    logits = logits + b_ref[...]            # padded cols carry -inf bias -> exp()==0

    # Numerically stable softmax over the last axis (== PyTorch dim=1).
    m = jnp.max(logits, axis=-1, keepdims=True)
    e = jnp.exp(logits - m)
    s = jnp.sum(e, axis=-1, keepdims=True)

    # EUP approximate reciprocal + one Newton-Raphson refinement (VALU is idle
    # in this HBM-bound kernel), giving near-exact probabilities for free.
    inv = pl.reciprocal(s, approx=True)
    inv = inv * (2.0 - s * inv)

    probs = e * inv                          # (tile_b, LANE) in VMEM only
    # Only the real actions go back to HBM (narrow (tile_b, n_act) block).
    o_ref[...] = probs[:, :n_act].astype(o_ref.dtype)


def prepare_params(weight, bias, n_pad=LANE):
    """One-time parameter prep (outside the hot path).

    weight: (n_act, in_dim), bias: (n_act,)  ->
      w_pad: (in_dim, n_pad)  pre-transposed, zero-filled columns beyond n_act
      b_pad: (1, n_pad) f32   -inf beyond n_act

    Padded weight columns are exactly zero and padded bias entries are -inf, so
    padded logits are exactly 0*x + (-inf) = -inf: they vanish in the softmax
    and can never produce NaN.
    """
    n_act, in_dim = weight.shape
    assert n_act <= n_pad, "n_act must fit within the lane padding"
    w_pad = jnp.zeros((in_dim, n_pad), weight.dtype).at[:, :n_act].set(weight.T)
    b_pad = jnp.full((1, n_pad), -jnp.inf, dtype=jnp.float32)
    b_pad = b_pad.at[0, :n_act].set(bias.astype(jnp.float32))
    return w_pad, b_pad


def _num_tensorcores():
    # v7x exposes 2 TensorCores per chip; v5e/v6e expose 1.
    try:
        kind = jax.devices()[0].device_kind.lower()
    except Exception:
        return 1
    return 2 if "v7" in kind else 1


def _batch_semantics(n_cores):
    # On multi-TC chips, CORE_PARALLEL actually shards the grid axis across
    # cores (the "parallel" string has near-zero codegen effect there).
    if n_cores > 1 and hasattr(pltpu, "CORE_PARALLEL"):
        return (pltpu.CORE_PARALLEL,)
    return ("parallel",)


def _default_tile_b(B, n_cores):
    if B <= 1024:
        return B  # single block: no per-step overhead, trivially fits VMEM
    # Large batches: 1024-8192-row tiles amortize the ~0.35 us per-grid-step
    # fixed cost; aim for >= 2 tiles per TensorCore so the DMA pipeline (and
    # v7x core sharding) has work to overlap.  Working set per tile is only
    # ~1 MiB even at 8192 rows (D=32 f32), far below scoped VMEM everywhere.
    min_tiles = 2 * max(1, n_cores)
    tile = min(8192, max(1024, -(-B // min_tiles)))
    return ((tile + 7) // 8) * 8  # multiple of 8 sublanes


def softmax_policy(x, w_pad, b_pad, n_act, tile_b=None, out_dtype=None):
    """x: (B, in_dim); w_pad: (in_dim, LANE); b_pad: (1, LANE) -> (B, n_act)."""
    B, D = x.shape
    n_pad = w_pad.shape[1]
    out_dtype = x.dtype if out_dtype is None else out_dtype

    n_cores = _num_tensorcores()
    if tile_b is None:
        tile_b = _default_tile_b(B, n_cores)

    grid = (pl.cdiv(B, tile_b),)

    return pl.pallas_call(
        _softmax_policy_kernel,
        out_shape=jax.ShapeDtypeStruct((B, n_act), out_dtype),
        grid_spec=pltpu.PrefetchScalarGridSpec(
            num_scalar_prefetch=0,
            grid=grid,
            in_specs=[
                pl.BlockSpec((tile_b, D), lambda i: (i, 0)),   # activations: tiled over B
                pl.BlockSpec((D, n_pad), lambda i: (0, 0)),    # weights: resident in VMEM
                pl.BlockSpec((1, n_pad), lambda i: (0, 0)),    # bias: resident in VMEM
            ],
            # Narrow output block: only the real n_act columns hit HBM.
            out_specs=pl.BlockSpec((tile_b, n_act), lambda i: (i, 0)),
        ),
        compiler_params=pltpu.CompilerParams(
            dimension_semantics=_batch_semantics(n_cores),
        ),
    )(x, w_pad, b_pad)


if __name__ == "__main__":
    key = jax.random.PRNGKey(0)
    B, in_dim, n_act = 8, 32, 3

    kx, kw, kb = jax.random.split(key, 3)
    x = jax.random.normal(kx, (B, in_dim), dtype=jnp.float32)

    # Deterministic init mirroring nn.Linear's uniform(-1/sqrt(D), 1/sqrt(D)).
    bound = 1.0 / (in_dim ** 0.5)
    weight = jax.random.uniform(kw, (n_act, in_dim), minval=-bound, maxval=bound,
                                dtype=jnp.float32)
    bias = jax.random.uniform(kb, (n_act,), minval=-bound, maxval=bound,
                              dtype=jnp.float32)

    # One-time parameter prep (pad + pre-transpose to lane-dense (K, N) layout).
    w_pad, b_pad = prepare_params(weight, bias)

    out = jax.block_until_ready(softmax_policy(x, w_pad, b_pad, n_act))
    ref = jax.nn.softmax(x @ weight.T + bias, axis=1)
    assert out.shape == (B, n_act)
    assert out.dtype == jnp.float32
    assert jnp.allclose(out, ref, atol=5e-4, rtol=5e-4)
    assert jnp.allclose(jnp.sum(out, axis=1), 1.0, atol=5e-4)

    # Secondary check: large batch exercises the tiled / pipelined path (grid >= 2).
    B_big = 4096
    x_big = jax.random.normal(jax.random.PRNGKey(1), (B_big, in_dim), dtype=jnp.float32)
    out_big = jax.block_until_ready(softmax_policy(x_big, w_pad, b_pad, n_act))
    ref_big = jax.nn.softmax(x_big @ weight.T + bias, axis=1)
    assert out_big.shape == (B_big, n_act)
    assert jnp.allclose(out_big, ref_big, atol=5e-4, rtol=5e-4)
    assert jnp.allclose(jnp.sum(out_big, axis=1), 1.0, atol=5e-4)

    print("KERNEL_OK")
</pallas_src>

<mosaic_0001>
module attributes {stable_mosaic.version = 11 : i64} {
  func.func @_softmax_policy_kernel(%arg0: i32, %arg1: memref<8x32xf32, #tpu.memory_space<vmem>>, %arg2: memref<32x128xf32, #tpu.memory_space<vmem>>, %arg3: memref<1x128xf32, #tpu.memory_space<vmem>>, %arg4: memref<8x3xf32, #tpu.memory_space<vmem>>) attributes {dimension_semantics = [#tpu.dimension_semantics<parallel>], iteration_bounds = array<i64: 1>, scalar_prefetch = 0 : i64, scratch_operands = 0 : i64, tpu.core_type = #tpu.core_type<tc>, window_params = [{transform_indices = @transform_0, window_bounds = array<i64: 8, 32>}, {pipeline_mode = #tpu.pipeline_mode<synchronous>, transform_indices = @transform_1, window_bounds = array<i64: 32, 128>}, {pipeline_mode = #tpu.pipeline_mode<synchronous>, transform_indices = @transform_2, window_bounds = array<i64: 1, 128>}, {transform_indices = @transform_3, window_bounds = array<i64: 8, 3>}]} {
    %c0 = arith.constant 0 : index
    %c0_0 = arith.constant 0 : index
    %0 = vector.load %arg1[%c0, %c0_0] : memref<8x32xf32, #tpu.memory_space<vmem>>, vector<8x32xf32>
    %c0_1 = arith.constant 0 : index
    %c0_2 = arith.constant 0 : index
    %1 = vector.load %arg2[%c0_1, %c0_2] : memref<32x128xf32, #tpu.memory_space<vmem>>, vector<32x128xf32>
    %cst = arith.constant dense<0.000000e+00> : vector<8x128xf32>
    %2 = tpu.matmul %0, %1, %cst {dimension_numbers = #tpu.dot_dimension_numbers<[1], [0], [0], [1], [0, 0, 1, 1], [], []>} : vector<8x32xf32>, vector<32x128xf32>, vector<8x128xf32> -> vector<8x128xf32>
    %c0_3 = arith.constant 0 : index
    %c0_4 = arith.constant 0 : index
    %3 = vector.load %arg3[%c0_3, %c0_4] : memref<1x128xf32, #tpu.memory_space<vmem>>, vector<1x128xf32>
    %4 = vector.broadcast %3 : vector<1x128xf32> to vector<8x128xf32>
    %5 = arith.addf %2, %4 : vector<8x128xf32>
    %cst_5 = arith.constant dense<0xFF800000> : vector<8xf32>
    %6 = vector.multi_reduction <maximumf>, %5, %cst_5 [1] : vector<8x128xf32> to vector<8xf32>
    %7 = vector.shape_cast %6 : vector<8xf32> to vector<8x1xf32>
    %8 = vector.broadcast %7 : vector<8x1xf32> to vector<8x128xf32>
    %9 = arith.subf %5, %8 : vector<8x128xf32>
    %10 = math.exp %9 : vector<8x128xf32>
    %cst_6 = arith.constant dense<0.000000e+00> : vector<8xf32>
    %11 = vector.multi_reduction <add>, %10, %cst_6 [1] : vector<8x128xf32> to vector<8xf32>
    %12 = vector.shape_cast %11 : vector<8xf32> to vector<8x1xf32>
    %13 = tpu.reciprocal %12 {approx = true} : vector<8x1xf32> -> vector<8x1xf32>
    %14 = arith.mulf %12, %13 : vector<8x1xf32>
    %cst_7 = arith.constant 2.000000e+00 : f32
    %15 = vector.broadcast %cst_7 : f32 to vector<8x1xf32>
    %16 = arith.subf %15, %14 : vector<8x1xf32>
    %17 = arith.mulf %13, %16 : vector<8x1xf32>
    %18 = vector.broadcast %17 : vector<8x1xf32> to vector<8x128xf32>
    %19 = arith.mulf %10, %18 : vector<8x128xf32>
    %20 = vector.extract_strided_slice %19 {offsets = [0, 0], sizes = [8, 3], strides = [1, 1]} : vector<8x128xf32> to vector<8x3xf32>
    %c0_8 = arith.constant 0 : index
    %c0_9 = arith.constant 0 : index
    %21 = vector.load %arg4[%c0_8, %c0_9] : memref<8x3xf32, #tpu.memory_space<vmem>>, vector<8x3xf32>
    tpu.vector_store %arg4[%c0_8, %c0_9], %20 {strides = array<i32>} : memref<8x3xf32, #tpu.memory_space<vmem>>, vector<8x3xf32>,
    return
  }
  func.func @transform_0(%arg0: i32) -> (i32, i32) {
    %c0_i32 = arith.constant 0 : i32
    %c0_i32_0 = arith.constant 0 : i32
    return %arg0, %c0_i32 : i32, i32
  }
  func.func @transform_1(%arg0: i32) -> (i32, i32) {
    %c0_i32 = arith.constant 0 : i32
    %c0_i32_0 = arith.constant 0 : i32
    %c0_i32_1 = arith.constant 0 : i32
    return %c0_i32, %c0_i32_0 : i32, i32
  }
  func.func @transform_2(%arg0: i32) -> (i32, i32) {
    %c0_i32 = arith.constant 0 : i32
    %c0_i32_0 = arith.constant 0 : i32
    %c0_i32_1 = arith.constant 0 : i32
    return %c0_i32, %c0_i32_0 : i32, i32
  }
  func.func @transform_3(%arg0: i32) -> (i32, i32) {
    %c0_i32 = arith.constant 0 : i32
    %c0_i32_0 = arith.constant 0 : i32
    return %arg0, %c0_i32 : i32, i32
  }
}

</mosaic_0001>

<bundles_post_ra>
// kernel: tpu_custom_call.1
= control target key start
LH: loop header
LB: loop body
LE: loop exit
PB: predicated region body
PF: predicated region fallthrough
CT: control target
= control target key end

     0   :  { %8 = vsyncpa [#allocation3], 0  ;;  %s293_s0 = inlined_call_operand.hbm [shape: f32[8,32], index: 0, kind: input, shape index: {}]   ;;  %s294_s1 = inlined_call_operand.hbm [shape: f32[32,128], index: 1, kind: input, shape index: {}]   ;;  %s295_s2 = inlined_call_operand.vmem [shape: f32[1,128], index: 2, kind: input, shape index: {}]   ;;  %s296_s3 = inlined_call_operand.vmem [shape: f32[8,3], index: 3, kind: output, shape index: {}]  }
   0x1   :  { %9 = vsyncpa [#allocation5], 0  ;;  %s229_s12 = smov [#allocation2]   ;;  %s230_s14 = smov [#allocation4]  }
   0x2   :  { %s16_s13 = sshll.u32 %s229_s12, 4  ;;  %s25_s15 = sshll.u32 %s230_s14, 4  ;;  %s17_s13 = int_to_ptr.vmem [resolvable:$true] %s16_s13  ;;  %s256_s15 = int_to_ptr.vmem [resolvable:$true] %s25_s15 }
   0x3   :  { %s181_s18 = scalar_lea.hbm %s293_s0, 128 }
   0x4   :  { %p182_p0 = scmp.ne.s32.totalorder %s293_s0, %s181_s18  ;;  %p185_p1 = scmp.lt.u32.totalorder %s181_s18, %s293_s0 }
   0x6   :  { %p187_p2 = pnand %p185_p1, %p182_p0 }
   0x8   :  { %190 = shalt.err (!%p187_p2)
}
   0x9   :  { %s191_s23 = scalar_lea.vmem %s17_s13, 128  ;;  %p196_p4 = scmp.lt.s32.totalorder %s17_s13, %s17_s13 }
   0xa   :  { %p192_p3 = scmp.ne.s32.totalorder %s17_s13, %s191_s23  ;;  %p197_p5 = scmp.lt.s32.totalorder %s191_s23, %s191_s23 }
   0xc   :  { %p198_p6 = por %p197_p5, %p196_p4 }
   0xe   :  { %p199_p7 = pnand %p198_p6, %p192_p3 }
  0x10   :  { %202 = shalt.err (!%p199_p7)
}
  0x11   :  { %19 = dma.hbm_to_vmem [thread:$0]  %s293_s0, 128, %s17_s13, [#allocation3]  }
  0x12   :  { %s203_s28 = scalar_lea.hbm %s294_s1, 512 }
  0x13   :  { %p204_p8 = scmp.ne.s32.totalorder %s294_s1, %s203_s28  ;;  %p207_p9 = scmp.lt.u32.totalorder %s203_s28, %s294_s1 }
  0x15   :  { %p209_p10 = pnand %p207_p9, %p204_p8 }
  0x17   :  { %212 = shalt.err (!%p209_p10)
}
  0x18   :  { %s213_s6 = scalar_lea.vmem %s256_s15, 512  ;;  %p218_p12 = scmp.lt.s32.totalorder %s256_s15, %s256_s15 }
  0x19   :  { %p214_p11 = scmp.ne.s32.totalorder %s256_s15, %s213_s6  ;;  %p219_p13 = scmp.lt.s32.totalorder %s213_s6, %s213_s6 }
  0x1b   :  { %p220_p0 = por %p219_p13, %p218_p12 }
  0x1d   :  { %p221_p1 = pnand %p220_p0, %p214_p11 }
  0x1f   :  { %224 = shalt.err (!%p221_p1)
}
  0x20   :  { %s231_s0 = smov 128   ;;  %s232_s7 = smov 8  }
  0x21   :  { %31 = dma.hbm_to_vmem [thread:$0]  %s294_s1, 512, %s256_s15, [#allocation5], %s231_s0, %s231_s0, %s232_s7  }
  0x22   :  { %225 = dma.done.wait [#allocation3], 128  }
  0x23   :  { %226 = vsyncadd [#allocation3], 4294967168 }
  0x24   :  { %227 = dma.done.wait [#allocation5], 512  }
  0x25   :  { %228 = vsyncadd [#allocation5], 4294966784  ;;  %v233_v0 = vmov 0.0|0.0   ;;  %vm234_vm0 = vmmov 0   ;;  %v235_v1 = vmov 0.0   ;;  %v41_v2 = vld [vmem:[#allocation4] sm:$0xff] }
  0x26   :  { %164 = vmatprep.subr.bf16.mxu0 %v233_v0  ;;  %161 = vmatprep.mubr.msk.f32.mxu0 %vm234_vm0, %v235_v1  ;;  %v42_v3 = vld [vmem:[#allocation4 + $0x8] sm:$0xff]  ;;  %v43_v4 = vld [vmem:[#allocation4 + $0x10] sm:$0xff]  ;;  %v44_v6 = vld [vmem:[#allocation4 + $0x18] sm:$0xff]  ;;  %vm52_vm1 = vcmask 261120   ;;  %vm138_vm2 = vcmask 23552  }
  0x27   :  { %v165_v5 = vpack.c.bf16 %v42_v3, %v41_v2  ;;  %v168_v7 = vpack.c.bf16 %v44_v6, %v43_v4  ;;  %v40_v8 = vld [vmem:[#allocation2] sm:$0xff]  ;;  %v146_v9 = vld [vmem:[%s295_s2] ss:$0 sm:$0xff] }
  0x29   :  { %166 = vmatpush3.bf16.msra.mxu0 %v165_v5 }
  0x2a   :  { %167 = vmatprep.subr.bf16.mxu0 %v233_v0 }
  0x2d   :  { %169 = vmatpush3.bf16.msra.mxu0 %v168_v7 }
  0x30   :  { %162 = vmatmul.mubr.msk.f32.vlgmr.msra.gmra.mrb[0].mxu0 %vm52_vm1, %v40_v8 }
 0x103   :  { %v122_v10 = vpop.f32.mrb[0].mxu0 }
 0x104   :  { %v123_v11 = vadd.f32 %v146_v9, %v122_v10  ;;  %v163_v12 = vpop.f32.mrb[1].mxu0 }
 0x106   :  { %126 = vmax.xlane.f32.xlu0 %v123_v11 }
 0x193   :  { %v127_v13 = vpop.xlane.xlu0 %126 }
 0x194   :  { %v128_v14 = vsub.f32 %v123_v11, %v127_v13 }
 0x196   :  { %v129_v15 = vmul.f32 1.442695, %v128_v14 }
 0x198   :  { %177 = vpow2.f32 %v129_v15 }
 0x1a2   :  { %v178_v16 = vpop.eup %177 }
 0x1a3   :  { %131 = vadd.xlane.f32.xlu0 %v178_v16 }
 0x230   :  { %v132_v17 = vpop.xlane.xlu0 %131 }
 0x231   :  { %179 = vrcp.f32 %v132_v17 }
 0x23b   :  { %v180_v18 = vpop.eup %179 }
 0x23c   :  { %v134_v19 = vmul.f32 %v180_v18, %v132_v17 }
 0x23e   :  { %v135_v20 = vsub.f32 2.0, %v134_v19 }
 0x240   :  { %v136_v21 = vmul.f32 %v180_v18, %v135_v20 }
 0x242   :  { %v137_v22 = vmul.f32 %v178_v16, %v136_v21 }
 0x244   :  { %139 = vst.msk [vmem:[%s296_s3] sm:$0xff] %vm138_vm2, %v137_v22 }
 0x245   :  { %144 = vsyncpa [#allocation3], 1 }
 0x246   :  { %145 = vsyncpa [#allocation5], 1 }

</bundles_post_ra>
